<compile_context>
chip_gen: v7x
topology: tpu7x:2x2x1
jax: 0.10.0
libtpu: 0.0.40
codegen_flags: <defaults>
</compile_context>

<pallas_src>
import jax
import jax.numpy as jnp
from jax.experimental import pallas as pl
from jax.experimental.pallas import tpu as pltpu


# ----------------------------------------------------------------------------
# Pallas kernel.  One grid step processes `block_b` batch elements, folded
# into the row (sublane) axis.  Shapes inside the kernel:
#   labels_row_ref : [1, Bn]   int32  augmented ids = local_batch*C + label
#   labels_col_ref : [Bn, 1]   int32  same values, column orientation
#   h_ref          : [Bn, D]   f32    node hidden states
#   ch_ref         : [Bc, D]   f32    cluster hidden states
#   w_ref          : [3D, 4D]  f32    [[w_ir|w_iz|w_in|0],[w_hr|w_hz|0|w_hn],[w_p|0|0|0]]
#   b_ref          : [2, 4D]   f32    [[b_r|b_z|b_in|b_hn],[b_p|0|0|0]]
# ----------------------------------------------------------------------------
def _cluster_gat_kernel(labels_row_ref, labels_col_ref, h_ref, ch_ref,
                        w_ref, b_ref, h_out_ref, ch_out_ref):
    Bn, D = h_ref.shape
    Bc = ch_ref.shape[0]

    h = h_ref[...]                                   # [Bn, D]
    ch = ch_ref[...]                                 # [Bc, D]
    labels_row = labels_row_ref[...]                 # [1, Bn]
    labels_col = labels_col_ref[...]                 # [Bn, 1]

    # Block-diagonal one-hot for aggregation: onehot[r, j] = 1 iff node j
    # belongs to augmented cluster-row r = local_batch*C + label[j].
    row_ids = jax.lax.broadcasted_iota(jnp.int32, (Bc, Bn), 0)
    onehot = (row_ids == labels_row).astype(jnp.float32)            # [Bc, Bn]

    # Transposed one-hot built directly (no XLU transpose) for the scatter.
    col_ids = jax.lax.broadcasted_iota(jnp.int32, (Bn, Bc), 1)
    onehot_t = (col_ids == labels_col).astype(jnp.float32)          # [Bn, Bc]

    # Per-(batch, cluster) mean of node hidden states.
    counts = jnp.sum(onehot, axis=-1, keepdims=True)                # [Bc, 1]
    agg = jnp.dot(onehot, h, preferred_element_type=jnp.float32)    # [Bc, D]
    agg_mean = agg / jnp.maximum(counts, 1.0)
    present = counts > 0.0                                          # [Bc, 1]

    # Packed parameters.
    w_gates = w_ref[0:2 * D, :]                                     # [2D, 4D]
    w_p = w_ref[2 * D:3 * D, 0:D]                                   # [D, D]
    b_gates = b_ref[0:1, :]                                         # [1, 4D]
    b_p = b_ref[1:2, 0:D]                                           # [1, D]

    # Single fused GRU gate matmul (K = 2D, N = 4D lane-dense result).
    xh = jnp.concatenate([agg_mean, ch], axis=-1)                   # [Bc, 2D]
    pre = jnp.dot(xh, w_gates, preferred_element_type=jnp.float32) + b_gates
    r = jax.nn.sigmoid(pre[:, 0:D])
    z = jax.nn.sigmoid(pre[:, D:2 * D])
    n = jnp.tanh(pre[:, 2 * D:3 * D] + r * pre[:, 3 * D:4 * D])
    gru_out = (1.0 - z) * n + z * ch
    new_ch = jnp.where(present, gru_out, ch)                        # [Bc, D]
    ch_out_ref[...] = new_ch

    # cluster -> node projection, scattered back to every node's cluster row.
    proj = jnp.dot(new_ch, w_p, preferred_element_type=jnp.float32) + b_p
    h_out_ref[...] = h + jnp.dot(onehot_t, proj,
                                 preferred_element_type=jnp.float32)


# ----------------------------------------------------------------------------
# Wrapper: batched over independent cell instances.
# ----------------------------------------------------------------------------
def _auto_num_blocks(B, N, C):
    """1 block on single-TC chips (v5e/v6e); 2 parallel blocks on v7x."""
    try:
        kind = jax.devices()[0].device_kind.lower()
    except Exception:
        kind = ""
    two_tc = ("v7" in kind) or ("7x" in kind)
    if (two_tc and B % 2 == 0
            and ((B // 2) * N) % 8 == 0 and ((B // 2) * C) % 8 == 0):
        return 2
    return 1


def cluster_gat_cell(x, h, cluster_h, cluster_labels, params, *, num_blocks=None):
    # `x` only feeds the dead attention/MLP branch of the torch forward.
    del x
    B, N, D = h.shape
    C = cluster_h.shape[1]
    if num_blocks is None:
        num_blocks = _auto_num_blocks(B, N, C)
    assert B % num_blocks == 0, "batch must be divisible by num_blocks"
    block_b = B // num_blocks
    bn = block_b * N
    bc = block_b * C
    if num_blocks > 1:
        assert bn % 8 == 0 and bc % 8 == 0, "per-block rows must be 8-aligned"

    # Fold batch into the row (sublane) axis -> 2-D lane-contiguous operands.
    h2 = h.reshape(B * N, D).astype(jnp.float32)
    ch2 = cluster_h.reshape(B * C, D).astype(jnp.float32)

    # Augmented cluster id = local_batch_within_block * C + cluster_label,
    # i.e. directly the row index of the block-diagonal one-hot matrix.
    local_b = (jnp.arange(B, dtype=jnp.int32) % block_b)[:, None]
    aug = (cluster_labels.astype(jnp.int32) + local_b * C)          # [B, N]
    aug_row = aug.reshape(num_blocks, 1, bn)
    aug_col = aug.reshape(B * N, 1)

    # Pack all weights / biases into two aligned buffers (fewer DMAs, one
    # wide lane-dense gate matmul inside the kernel).
    f32 = jnp.float32
    zdd = jnp.zeros((D, D), f32)
    wi_row = jnp.concatenate(
        [params["w_ir"], params["w_iz"], params["w_in"], zdd], axis=1)  # [D,4D]
    wh_row = jnp.concatenate(
        [params["w_hr"], params["w_hz"], zdd, params["w_hn"]], axis=1)  # [D,4D]
    wp_row = jnp.concatenate(
        [params["w_p"], jnp.zeros((D, 3 * D), f32)], axis=1)            # [D,4D]
    w_all = jnp.concatenate([wi_row, wh_row, wp_row], axis=0).astype(f32)  # [3D,4D]

    b_gates = jnp.concatenate([params["b_ir"] + params["b_hr"],
                               params["b_iz"] + params["b_hz"],
                               params["b_in"], params["b_hn"]])          # [4D]
    b_p_row = jnp.concatenate([params["b_p"], jnp.zeros((3 * D,), f32)])
    b_all = jnp.stack([b_gates, b_p_row], axis=0).astype(f32)            # [2,4D]

    h_out2, ch_out2 = pl.pallas_call(
        _cluster_gat_kernel,
        out_shape=(
            jax.ShapeDtypeStruct((B * N, D), jnp.float32),
            jax.ShapeDtypeStruct((B * C, D), jnp.float32),
        ),
        grid=(num_blocks,),
        in_specs=[
            pl.BlockSpec((None, 1, bn), lambda i: (i, 0, 0)),   # labels (row)
            pl.BlockSpec((bn, 1), lambda i: (i, 0)),            # labels (col)
            pl.BlockSpec((bn, D), lambda i: (i, 0)),            # node hidden
            pl.BlockSpec((bc, D), lambda i: (i, 0)),            # cluster hidden
            pl.BlockSpec((3 * D, 4 * D), lambda i: (0, 0)),     # packed weights
            pl.BlockSpec((2, 4 * D), lambda i: (0, 0)),         # packed biases
        ],
        out_specs=(
            pl.BlockSpec((bn, D), lambda i: (i, 0)),
            pl.BlockSpec((bc, D), lambda i: (i, 0)),
        ),
        compiler_params=pltpu.CompilerParams(
            dimension_semantics=("parallel",)),
    )(aug_row, aug_col, h2, ch2, w_all, b_all)

    return h_out2.reshape(B, N, D), ch_out2.reshape(B, C, D)


# ----------------------------------------------------------------------------
# Pure-JAX reference (mirrors the torch forward's live path), one instance.
# ----------------------------------------------------------------------------
def _reference_single(h, cluster_h, labels, params):
    C, D = cluster_h.shape
    onehot = jax.nn.one_hot(labels, C, dtype=jnp.float32).T       # [C, N]
    counts = onehot.sum(-1, keepdims=True)
    agg_mean = (onehot @ h) / jnp.maximum(counts, 1.0)
    present = counts > 0

    r = jax.nn.sigmoid(agg_mean @ params["w_ir"] + params["b_ir"]
                       + cluster_h @ params["w_hr"] + params["b_hr"])
    z = jax.nn.sigmoid(agg_mean @ params["w_iz"] + params["b_iz"]
                       + cluster_h @ params["w_hz"] + params["b_hz"])
    n = jnp.tanh(agg_mean @ params["w_in"] + params["b_in"]
                 + r * (cluster_h @ params["w_hn"] + params["b_hn"]))
    gru_out = (1.0 - z) * n + z * cluster_h
    new_ch = jnp.where(present, gru_out, cluster_h)

    proj = new_ch @ params["w_p"] + params["b_p"]
    final_h = h + proj[labels]
    return final_h, new_ch


# ----------------------------------------------------------------------------
# Main
# ----------------------------------------------------------------------------
if __name__ == "__main__":
    B, N, D, C = 8, 16, 32, 4      # batch of cells, num_nodes, input_size, clusters

    key = jax.random.PRNGKey(0)
    ks = jax.random.split(key, 20)

    def w(k, shape, scale=0.1):
        return (scale * jax.random.normal(k, shape)).astype(jnp.float32)

    params = {
        # GRUCell weights, pre-transposed to [in, out], split per gate (r, z, n)
        "w_ir": w(ks[0], (D, D)), "w_iz": w(ks[1], (D, D)), "w_in": w(ks[2], (D, D)),
        "w_hr": w(ks[3], (D, D)), "w_hz": w(ks[4], (D, D)), "w_hn": w(ks[5], (D, D)),
        "b_ir": w(ks[6], (D,)), "b_iz": w(ks[7], (D,)), "b_in": w(ks[8], (D,)),
        "b_hr": w(ks[9], (D,)), "b_hz": w(ks[10], (D,)), "b_hn": w(ks[11], (D,)),
        # cluster_to_node_proj (xavier-normal-ish small init, zero bias)
        "w_p": w(ks[12], (D, D), scale=0.05),
        "b_p": jnp.zeros((D,), jnp.float32),
    }

    x = w(ks[13], (B, N, D), scale=1.0)   # unused by live path (dead branch)
    h = w(ks[14], (B, N, D), scale=1.0)
    cluster_h = w(ks[15], (B, C, D), scale=1.0)
    cluster_labels = jax.random.randint(ks[16], (B, N), 0, C, dtype=jnp.int32)

    out_h, out_ch = cluster_gat_cell(x, h, cluster_h, cluster_labels, params)
    jax.block_until_ready((out_h, out_ch))

    ref_h, ref_ch = jax.vmap(_reference_single, in_axes=(0, 0, 0, None))(
        h, cluster_h, cluster_labels, params)

    assert jnp.allclose(out_h, ref_h, atol=1e-4, rtol=1e-4), "node hidden mismatch"
    assert jnp.allclose(out_ch, ref_ch, atol=1e-4, rtol=1e-4), "cluster hidden mismatch"

    print("KERNEL_OK")
</pallas_src>

<mosaic_0001>
module attributes {stable_mosaic.version = 11 : i64} {
  func.func @_cluster_gat_kernel(%arg0: i32, %arg1: memref<1x1x128xi32, #tpu.memory_space<vmem>>, %arg2: memref<128x1xi32, #tpu.memory_space<vmem>>, %arg3: memref<128x32xf32, #tpu.memory_space<vmem>>, %arg4: memref<32x32xf32, #tpu.memory_space<vmem>>, %arg5: memref<96x128xf32, #tpu.memory_space<vmem>>, %arg6: memref<2x128xf32, #tpu.memory_space<vmem>>, %arg7: memref<128x32xf32, #tpu.memory_space<vmem>>, %arg8: memref<32x32xf32, #tpu.memory_space<vmem>>) attributes {dimension_semantics = [#tpu.dimension_semantics<parallel>], iteration_bounds = array<i64: 1>, scalar_prefetch = 0 : i64, scratch_operands = 0 : i64, tpu.core_type = #tpu.core_type<tc>, window_params = [{transform_indices = @transform_0, window_bounds = array<i64: 1, 1, 128>}, {transform_indices = @transform_1, window_bounds = array<i64: 128, 1>}, {transform_indices = @transform_2, window_bounds = array<i64: 128, 32>}, {transform_indices = @transform_3, window_bounds = array<i64: 32, 32>}, {pipeline_mode = #tpu.pipeline_mode<synchronous>, transform_indices = @transform_4, window_bounds = array<i64: 96, 128>}, {pipeline_mode = #tpu.pipeline_mode<synchronous>, transform_indices = @transform_5, window_bounds = array<i64: 2, 128>}, {transform_indices = @transform_6, window_bounds = array<i64: 128, 32>}, {transform_indices = @transform_7, window_bounds = array<i64: 32, 32>}]} {
    %c0 = arith.constant 0 : index
    %c0_0 = arith.constant 0 : index
    %0 = vector.load %arg3[%c0, %c0_0] : memref<128x32xf32, #tpu.memory_space<vmem>>, vector<128x32xf32>
    %c0_1 = arith.constant 0 : index
    %c0_2 = arith.constant 0 : index
    %1 = vector.load %arg4[%c0_1, %c0_2] : memref<32x32xf32, #tpu.memory_space<vmem>>, vector<32x32xf32>
    %c0_3 = arith.constant 0 : index
    %c0_4 = arith.constant 0 : index
    %c0_5 = arith.constant 0 : index
    %2 = vector.load %arg1[%c0_3, %c0_4, %c0_5] : memref<1x1x128xi32, #tpu.memory_space<vmem>>, vector<1x1x128xi32>
    %3 = vector.shape_cast %2 : vector<1x1x128xi32> to vector<1x128xi32>
    %c0_6 = arith.constant 0 : index
    %c0_7 = arith.constant 0 : index
    %4 = vector.load %arg2[%c0_6, %c0_7] : memref<128x1xi32, #tpu.memory_space<vmem>>, vector<128x1xi32>
    %5 = tpu.iota {dimensions = array<i32: 0>} : vector<32x128xi32>
    %6 = vector.broadcast %3 : vector<1x128xi32> to vector<32x128xi32>
    %7 = arith.cmpi eq, %5, %6 : vector<32x128xi32>
    %8 = arith.extui %7 : vector<32x128xi1> to vector<32x128xi32>
    %9 = arith.sitofp %8 : vector<32x128xi32> to vector<32x128xf32>
    %10 = tpu.iota {dimensions = array<i32: 1>} : vector<128x32xi32>
    %11 = vector.broadcast %4 : vector<128x1xi32> to vector<128x32xi32>
    %12 = arith.cmpi eq, %10, %11 : vector<128x32xi32>
    %13 = arith.extui %12 : vector<128x32xi1> to vector<128x32xi32>
    %14 = arith.sitofp %13 : vector<128x32xi32> to vector<128x32xf32>
    %cst = arith.constant dense<0.000000e+00> : vector<32xf32>
    %15 = vector.multi_reduction <add>, %9, %cst [1] : vector<32x128xf32> to vector<32xf32>
    %16 = vector.shape_cast %15 : vector<32xf32> to vector<32x1xf32>
    %cst_8 = arith.constant dense<0.000000e+00> : vector<32x32xf32>
    %17 = tpu.matmul %9, %0, %cst_8 {dimension_numbers = #tpu.dot_dimension_numbers<[1], [0], [0], [1], [0, 0, 1, 1], [], []>} : vector<32x128xf32>, vector<128x32xf32>, vector<32x32xf32> -> vector<32x32xf32>
    %cst_9 = arith.constant 1.000000e+00 : f32
    %18 = vector.broadcast %cst_9 : f32 to vector<32x1xf32>
    %19 = arith.maximumf %16, %18 : vector<32x1xf32>
    %20 = vector.broadcast %19 : vector<32x1xf32> to vector<32x32xf32>
    %21 = arith.divf %17, %20 : vector<32x32xf32>
    %cst_10 = arith.constant 0.000000e+00 : f32
    %22 = vector.broadcast %cst_10 : f32 to vector<32x1xf32>
    %23 = arith.cmpf ogt, %16, %22 : vector<32x1xf32>
    %c0_11 = arith.constant 0 : index
    %c0_12 = arith.constant 0 : index
    %24 = vector.load %arg5[%c0_11, %c0_12] : memref<96x128xf32, #tpu.memory_space<vmem>>, vector<64x128xf32>
    %c64 = arith.constant 64 : index
    %c0_13 = arith.constant 0 : index
    %25 = vector.load %arg5[%c64, %c0_13] : memref<96x128xf32, #tpu.memory_space<vmem>>, vector<32x32xf32>
    %c0_14 = arith.constant 0 : index
    %c0_15 = arith.constant 0 : index
    %26 = vector.load %arg6[%c0_14, %c0_15] : memref<2x128xf32, #tpu.memory_space<vmem>>, vector<1x128xf32>
    %c1 = arith.constant 1 : index
    %c0_16 = arith.constant 0 : index
    %27 = vector.load %arg6[%c1, %c0_16] : memref<2x128xf32, #tpu.memory_space<vmem>>, vector<1x32xf32>
    %28 = tpu.concatenate %21, %1 in 1 : vector<32x32xf32>, vector<32x32xf32> -> vector<32x64xf32>
    %cst_17 = arith.constant dense<0.000000e+00> : vector<32x128xf32>
    %29 = tpu.matmul %28, %24, %cst_17 {dimension_numbers = #tpu.dot_dimension_numbers<[1], [0], [0], [1], [0, 0, 1, 1], [], []>} : vector<32x64xf32>, vector<64x128xf32>, vector<32x128xf32> -> vector<32x128xf32>
    %30 = vector.broadcast %26 : vector<1x128xf32> to vector<32x128xf32>
    %31 = arith.addf %29, %30 : vector<32x128xf32>
    %32 = vector.extract_strided_slice %31 {offsets = [0, 0], sizes = [32, 32], strides = [1, 1]} : vector<32x128xf32> to vector<32x32xf32>
    %33 = arith.negf %32 : vector<32x32xf32>
    %34 = math.exp %33 : vector<32x32xf32>
    %cst_18 = arith.constant 1.000000e+00 : f32
    %35 = vector.broadcast %cst_18 : f32 to vector<32x32xf32>
    %36 = arith.addf %35, %34 : vector<32x32xf32>
    %37 = arith.divf %35, %36 : vector<32x32xf32>
    %38 = vector.extract_strided_slice %31 {offsets = [0, 32], sizes = [32, 32], strides = [1, 1]} : vector<32x128xf32> to vector<32x32xf32>
    %39 = arith.negf %38 : vector<32x32xf32>
    %40 = math.exp %39 : vector<32x32xf32>
    %cst_19 = arith.constant 1.000000e+00 : f32
    %41 = vector.broadcast %cst_19 : f32 to vector<32x32xf32>
    %42 = arith.addf %41, %40 : vector<32x32xf32>
    %43 = arith.divf %41, %42 : vector<32x32xf32>
    %44 = vector.extract_strided_slice %31 {offsets = [0, 64], sizes = [32, 32], strides = [1, 1]} : vector<32x128xf32> to vector<32x32xf32>
    %45 = vector.extract_strided_slice %31 {offsets = [0, 96], sizes = [32, 32], strides = [1, 1]} : vector<32x128xf32> to vector<32x32xf32>
    %46 = arith.mulf %37, %45 : vector<32x32xf32>
    %47 = arith.addf %44, %46 : vector<32x32xf32>
    %48 = math.tanh %47 : vector<32x32xf32>
    %cst_20 = arith.constant 1.000000e+00 : f32
    %49 = vector.broadcast %cst_20 : f32 to vector<32x32xf32>
    %50 = arith.subf %49, %43 : vector<32x32xf32>
    %51 = arith.mulf %50, %48 : vector<32x32xf32>
    %52 = arith.mulf %43, %1 : vector<32x32xf32>
    %53 = arith.addf %51, %52 : vector<32x32xf32>
    %54 = vector.shape_cast %23 : vector<32x1xi1> to vector<32x1xi1>
    %55 = vector.broadcast %54 : vector<32x1xi1> to vector<32x32xi1>
    %56 = arith.select %55, %53, %1 : vector<32x32xi1>, vector<32x32xf32>
    %c0_21 = arith.constant 0 : index
    %c0_22 = arith.constant 0 : index
    %57 = vector.load %arg8[%c0_21, %c0_22] : memref<32x32xf32, #tpu.memory_space<vmem>>, vector<32x32xf32>
    tpu.vector_store %arg8[%c0_21, %c0_22], %56 {strides = array<i32>} : memref<32x32xf32, #tpu.memory_space<vmem>>, vector<32x32xf32>,
    %cst_23 = arith.constant dense<0.000000e+00> : vector<32x32xf32>
    %58 = tpu.matmul %56, %25, %cst_23 {dimension_numbers = #tpu.dot_dimension_numbers<[1], [0], [0], [1], [0, 0, 1, 1], [], []>} : vector<32x32xf32>, vector<32x32xf32>, vector<32x32xf32> -> vector<32x32xf32>
    %59 = vector.broadcast %27 : vector<1x32xf32> to vector<32x32xf32>
    %60 = arith.addf %58, %59 : vector<32x32xf32>
    %cst_24 = arith.constant dense<0.000000e+00> : vector<128x32xf32>
    %61 = tpu.matmul %14, %60, %cst_24 {dimension_numbers = #tpu.dot_dimension_numbers<[1], [0], [0], [1], [0, 0, 1, 1], [], []>} : vector<128x32xf32>, vector<32x32xf32>, vector<128x32xf32> -> vector<128x32xf32>
    %62 = arith.addf %0, %61 : vector<128x32xf32>
    %c0_25 = arith.constant 0 : index
    %c0_26 = arith.constant 0 : index
    %63 = vector.load %arg7[%c0_25, %c0_26] : memref<128x32xf32, #tpu.memory_space<vmem>>, vector<128x32xf32>
    tpu.vector_store %arg7[%c0_25, %c0_26], %62 {strides = array<i32>} : memref<128x32xf32, #tpu.memory_space<vmem>>, vector<128x32xf32>,
    return
  }
  func.func @transform_0(%arg0: i32) -> (i32, i32, i32) {
    %c0_i32 = arith.constant 0 : i32
    %c0_i32_0 = arith.constant 0 : i32
    %c0_i32_1 = arith.constant 0 : i32
    return %arg0, %c0_i32, %c0_i32_0 : i32, i32, i32
  }
  func.func @transform_1(%arg0: i32) -> (i32, i32) {
    %c0_i32 = arith.constant 0 : i32
    %c0_i32_0 = arith.constant 0 : i32
    return %arg0, %c0_i32 : i32, i32
  }
  func.func @transform_2(%arg0: i32) -> (i32, i32) {
    %c0_i32 = arith.constant 0 : i32
    %c0_i32_0 = arith.constant 0 : i32
    return %arg0, %c0_i32 : i32, i32
  }
  func.func @transform_3(%arg0: i32) -> (i32, i32) {
    %c0_i32 = arith.constant 0 : i32
    %c0_i32_0 = arith.constant 0 : i32
    return %arg0, %c0_i32 : i32, i32
  }
  func.func @transform_4(%arg0: i32) -> (i32, i32) {
    %c0_i32 = arith.constant 0 : i32
    %c0_i32_0 = arith.constant 0 : i32
    %c0_i32_1 = arith.constant 0 : i32
    return %c0_i32, %c0_i32_0 : i32, i32
  }
  func.func @transform_5(%arg0: i32) -> (i32, i32) {
    %c0_i32 = arith.constant 0 : i32
    %c0_i32_0 = arith.constant 0 : i32
    %c0_i32_1 = arith.constant 0 : i32
    return %c0_i32, %c0_i32_0 : i32, i32
  }
  func.func @transform_6(%arg0: i32) -> (i32, i32) {
    %c0_i32 = arith.constant 0 : i32
    %c0_i32_0 = arith.constant 0 : i32
    return %arg0, %c0_i32 : i32, i32
  }
  func.func @transform_7(%arg0: i32) -> (i32, i32) {
    %c0_i32 = arith.constant 0 : i32
    %c0_i32_0 = arith.constant 0 : i32
    return %arg0, %c0_i32 : i32, i32
  }
}

</mosaic_0001>

<bundles_post_ra>
// kernel: tpu_custom_call.1
= control target key start
LH: loop header
LB: loop body
LE: loop exit
PB: predicated region body
PF: predicated region fallthrough
CT: control target
= control target key end

     0   :  { %v63_v3 = vlaneseq  ;;  %v1258_v17 = vmov 1.0   ;;  %v1259_v18 = vmov 0.0   ;;  %s1761_s0 = inlined_call_operand.vmem [shape: s32[1,1,128], index: 0, kind: input, shape index: {}]   ;;  %s1762_s1 = inlined_call_operand.vmem [shape: s32[128,1], index: 1, kind: input, shape index: {}]   ;;  %s1763_s2 = inlined_call_operand.vmem [shape: f32[128,32], index: 2, kind: input, shape index: {}]   ;;  %s1764_s3 = inlined_call_operand.vmem [shape: f32[32,32], index: 3, kind: input, shape index: {}]   ;;  %s1765_s4 = inlined_call_operand.vmem [shape: f32[96,128], index: 4, kind: input, shape index: {}]   ;;  %s1766_s5 = inlined_call_operand.vmem [shape: f32[2,128], index: 5, kind: input, shape index: {}]   ;;  %s1767_s6 = inlined_call_operand.vmem [shape: f32[128,32], index: 6, kind: output, shape index: {0}]   ;;  %s1768_s7 = inlined_call_operand.hbm [shape: f32[32,32], index: 7, kind: output, shape index: {1}]  }
   0x1   :  { %v1310_v0 = vld [vmem:[%s1763_s2] sm:$0xff]  ;;  %v1315_v1 = vld [vmem:[%s1763_s2 + $0x8] sm:$0xff]  ;;  %v1320_v2 = vld [vmem:[%s1763_s2 + $0x10] sm:$0xff] }
   0x2   :  { %v1123_v4 = vpack.c.bf16 %v1315_v1, %v1310_v0  ;;  %v1327_v5 = vld [vmem:[%s1763_s2 + $0x18] sm:$0xff]  ;;  %v1334_v7 = vld [vmem:[%s1763_s2 + $0x20] sm:$0xff]  ;;  %v1339_v8 = vld [vmem:[%s1763_s2 + $0x28] sm:$0xff]  ;;  %v64_v9 = vshrl.u32 %v63_v3, 7 }
   0x3   :  { %v1127_v6 = vpack.c.bf16 %v1327_v5, %v1320_v2  ;;  %v1131_v12 = vpack.c.bf16 %v1339_v8, %v1334_v7  ;;  %v1351_v13 = vld [vmem:[%s1761_s0] ss:$0 sm:$0xff]  ;;  %v1358_v15 = vld [vmem:[%s1763_s2 + $0x30] sm:$0xff]  ;;  %v1363_v16 = vld [vmem:[%s1763_s2 + $0x38] sm:$0xff] }
   0x4   :  { %1124 = vmatprep.subr.bf16.mxu0 %v1123_v4  ;;  %v1342_v10 = vadd.s32 8, %v64_v9  ;;  %v1344_v11 = vadd.s32 16, %v64_v9  ;;  %v1353_v14 = vadd.s32 24, %v64_v9  ;;  %vm72_vm0 = vcmp.eq.s32.totalorder %v64_v9, %v1351_v13 }
   0x5   :  { %1126 = vmatpush3.bf16.msra.mxu0 %v1123_v4  ;;  %1049 = vmatprep.mubr.msk.f32.mxu0 %vm72_vm0, %v1258_v17  ;;  %v903_v19 = vsel %vm72_vm0, 1.0, %v1259_v18 }
   0x6   :  { %1128 = vmatprep.subr.bf16.mxu0 %v1127_v6  ;;  %vm74_vm1 = vcmp.eq.s32.totalorder %v1344_v11, %v1351_v13 }
   0x7   :  { %v905_v20 = vsel %vm74_vm1, 1.0, %v1259_v18 }
   0x8   :  { %13 = vsyncpa [#allocation3], 0  ;;  %vm73_vm2 = vcmp.eq.s32.totalorder %v1342_v10, %v1351_v13  ;;  %182 = vadd.xlane.f32.xlu0 %v903_v19  ;;  %v1135_v21 = vpack.c.bf16 %v1363_v16, %v1358_v15  ;;  %vm75_vm3 = vcmp.eq.s32.totalorder %v1353_v14, %v1351_v13  ;;  %186 = vadd.xlane.f32.xlu1 %v905_v20  ;;  %v1387_v23 = vld [vmem:[%s1763_s2 + $0x40] sm:$0xff]  ;;  %v1392_v24 = vld [vmem:[%s1763_s2 + $0x48] sm:$0xff]  ;;  %s1260_s19 = smov 32   ;;  %vm321_vm4 = vcmask 261120  }
   0x9   :  { %1130 = vmatpush3.bf16.msra.mxu0 %v1127_v6  ;;  %v904_v22 = vsel %vm73_vm2, 1.0, %v1259_v18  ;;  %v906_v25 = vsel %vm75_vm3, 1.0, %v1259_v18  ;;  %v1139_v26 = vpack.c.bf16 %v1392_v24, %v1387_v23  ;;  %v1403_v27 = vld [vmem:[%s1763_s2 + $0x50] sm:$0xff]  ;;  %v1408_v28 = vld [vmem:[%s1763_s2 + $0x58] sm:$0xff]  ;;  %v1415_v30 = vld [vmem:[%s1763_s2 + $0x60] sm:$0xff]  ;;  %vm330_vm5 = vcmask 523264  }
   0xa   :  { %1132 = vmatprep.subr.bf16.mxu0 %v1131_v12  ;;  %v1143_v29 = vpack.c.bf16 %v1408_v28, %v1403_v27  ;;  %v1420_v31 = vld [vmem:[%s1763_s2 + $0x68] sm:$0xff]  ;;  %v1427_v33 = vld [vmem:[%s1763_s2 + $0x70] sm:$0xff]  ;;  %v1432_v34 = vld [vmem:[%s1763_s2 + $0x78] sm:$0xff]  ;;  %s1261_s12 = smov 64  }
   0xb   :  { %v1147_v32 = vpack.c.bf16 %v1420_v31, %v1415_v30  ;;  %v1151_v35 = vpack.c.bf16 %v1432_v34, %v1427_v33  ;;  %v43_v36 = vld [vmem:[%s1764_s3 + $0x8] sm:$0xff]  ;;  %v291_v37 = vld [vmem:[%s1765_s4] sm:$0xff]  ;;  %v293_v40 = vld [vmem:[%s1765_s4 + $0x10] sm:$0xff] }
   0xc   :  { %184 = vadd.xlane.f32.xlu0 %v904_v22  ;;  %188 = vadd.xlane.f32.xlu1 %v906_v25  ;;  %v292_v38 = vld [vmem:[%s1765_s4 + $0x8] sm:$0xff]  ;;  %v294_v41 = vld [vmem:[%s1765_s4 + $0x18] sm:$0xff]  ;;  %v295_v43 = vld [vmem:[%s1765_s4 + $0x20] sm:$0xff] }
   0xd   :  { %1134 = vmatpush3.bf16.msra.mxu0 %v1131_v12  ;;  %v1155_v39 = vpack.c.bf16 %v292_v38, %v291_v37  ;;  %v1159_v42 = vpack.c.bf16 %v294_v41, %v293_v40  ;;  %v296_v44 = vld [vmem:[%s1765_s4 + $0x28] sm:$0xff]  ;;  %v44_v45 = vld [vmem:[%s1764_s3 + $0x10] sm:$0xff]  ;;  %v42_v46 = vld [vmem:[%s1764_s3] sm:$0xff] }
   0xe   :  { %1136 = vmatprep.subr.bf16.mxu0 %v1135_v21  ;;  %v1163_v47 = vpack.c.bf16 %v296_v44, %v295_v43  ;;  %v45_v48 = vld [vmem:[%s1764_s3 + $0x18] sm:$0xff]  ;;  %v297_v49 = vld [vmem:[%s1765_s4 + $0x30] sm:$0xff] }
   0xf   :  { %1156 = vmatprep.subr.bf16.mxu1 %v1155_v39  ;;  %v298_v50 = vld [vmem:[%s1765_s4 + $0x38] sm:$0xff] }
  0x10   :  { %1158 = vmatpush3.bf16.msra.mxu1 %v1155_v39  ;;  %v1167_v51 = vpack.c.bf16 %v298_v50, %v297_v49 }
  0x11   :  { %1138 = vmatpush3.bf16.msra.mxu0 %v1135_v21  ;;  %1160 = vmatprep.subr.bf16.mxu1 %v1159_v42 }
  0x12   :  { %1140 = vmatprep.subr.bf16.mxu0 %v1139_v26 }
  0x14   :  { %1162 = vmatpush3.bf16.msra.mxu1 %v1159_v42 }
  0x15   :  { %1142 = vmatpush3.bf16.msra.mxu0 %v1139_v26  ;;  %1164 = vmatprep.subr.bf16.mxu1 %v1163_v47 }
  0x16   :  { %1144 = vmatprep.subr.bf16.mxu0 %v1143_v29 }
  0x18   :  { %1166 = vmatpush3.bf16.msra.mxu1 %v1163_v47 }
  0x19   :  { %1146 = vmatpush3.bf16.msra.mxu0 %v1143_v29  ;;  %1168 = vmatprep.subr.bf16.mxu1 %v1167_v51 }
  0x1a   :  { %1148 = vmatprep.subr.bf16.mxu0 %v1147_v32 }
  0x1c   :  { %1170 = vmatpush3.bf16.msra.mxu1 %v1167_v51 }
  0x1d   :  { %1150 = vmatpush3.bf16.msra.mxu0 %v1147_v32  ;;  %311 = vrot.lane.b32.xlu1 %v43_v36, %s1260_s19  ;;  %v927_v32 = vld [vmem:[%s1766_s5] ss:$0 sm:$0xff] }
  0x1e   :  { %1152 = vmatprep.subr.bf16.mxu0 %v1151_v35 }
  0x21   :  { %1154 = vmatpush3.bf16.msra.mxu0 %v1151_v35  ;;  %313 = vrot.lane.b32.xlu1 %v44_v45, %s1260_s19 }
  0x22   :  { %309 = vrot.lane.b32.xlu0 %v42_v46, %s1260_s19 }
  0x24   :  { %1050 = vmatmul.mubr.msk.f32.vlgmr.msra.gmra.mrb[0].mxu0 %vm73_vm2, %v1258_v17 }
  0x25   :  { %1052 = vmatprep.mubr.msk.f32.mxu0 %vm74_vm1, %v1258_v17  ;;  %315 = vrot.lane.b32.xlu1 %v45_v48, %s1260_s19 }
  0x28   :  { %1053 = vmatmul.mubr.msk.f32.gmra.mrb[2].mxu0 %vm75_vm3, %v1258_v17 }
  0x95   :  { %v1488_v52 = vpop.xlane.xlu0 %182  ;;  %v1490_v53 = vpop.xlane.xlu1 %186 }
  0x96   :  { %v275_v57 = vmax.f32 %v1488_v52, 1.0  ;;  %v277_v59 = vmax.f32 %v1490_v53, 1.0  ;;  %vm287_vm7 = vcmp.gt.f32.partialorder %v1488_v52, 0.0  ;;  %vm289_vm9 = vcmp.gt.f32.partialorder %v1490_v53, 0.0  ;;  %v55_v53 = vld [vmem:[%s1762_s1 + $0x40] sm:$0xff] }
  0x99   :  { %v1492_v54 = vpop.xlane.xlu0 %184  ;;  %v1495_v56 = vpop.xlane.xlu1 %188 }
  0x9a   :  { %v276_v55 = vmax.f32 %v1492_v54, 1.0  ;;  %v278_v58 = vmax.f32 %v1495_v56, 1.0  ;;  %vm288_vm6 = vcmp.gt.f32.partialorder %v1492_v54, 0.0  ;;  %vm290_vm8 = vcmp.gt.f32.partialorder %v1495_v56, 0.0  ;;  %v56_v56 = vld [vmem:[%s1762_s1 + $0x48] sm:$0xff] }
  0x9c   :  { %1202 = vrcp.f32 %v276_v55 }
  0x9d   :  { %1204 = vrcp.f32 %v275_v57  ;;  %v1500_v60 = vpop.permute.xlu1 %311  ;;  %v1504_v10 = vpop.permute.xlu0 %309 }
  0x9e   :  { %1206 = vrcp.f32 %v278_v58 }
  0x9f   :  { %1208 = vrcp.f32 %v277_v59 }
  0xa1   :  { %v1502_v63 = vpop.permute.xlu1 %313 }
  0xa5   :  { %v1510_v25 = vpop.permute.xlu1 %315 }
  0xa6   :  { %v1203_v61 = vpop.eup %1202 }
  0xa7   :  { %v1205_v4 = vpop.eup %1204 }
  0xa8   :  { %v1207_v11 = vpop.eup %1206 }
  0xa9   :  { %v1209_v17 = vpop.eup %1208 }
  0xf7   :  { %v1051_v62 = vpop.f32.mrb[0].mxu0 }
  0xf8   :  { %v282_v6 = vmul.f32 %v1203_v61, %v1051_v62  ;;  %v256_v9 = vpop.f32.mrb[1].mxu0 }
  0xf9   :  { %v280_v12 = vmul.f32 %v1205_v4, %v256_v9 }
  0xfa   :  { %v323_v21 = vsel %vm321_vm4, %v282_v6, %v1500_v60 }
  0xfb   :  { %v1054_v13 = vpop.f32.mrb[2].mxu0  ;;  %v322_v14 = vsel %vm321_vm4, %v280_v12, %v1504_v10 }
  0xfc   :  { %v286_v19 = vmul.f32 %v1207_v11, %v1054_v13  ;;  %v266_v20 = vpop.f32.mrb[3].mxu0  ;;  %1071 = vmatprep.mubr.msk.f32.mxu1 %vm330_vm5, %v322_v14 }
  0xfd   :  { %v284_v22 = vmul.f32 %v1209_v17, %v266_v20  ;;  %1072 = vmatmul.mubr.msk.f32.vlgmr.msra.gmra.mrb[0].mxu1 %vm330_vm5, %v323_v21 }
  0xfe   :  { %v325_v29 = vsel %vm321_vm4, %v286_v19, %v1510_v25 }
  0xff   :  { %v324_v26 = vsel %vm321_vm4, %v284_v22, %v1502_v63 }
 0x100   :  { %1074 = vmatprep.mubr.msk.f32.mxu1 %vm330_vm5, %v324_v26 }
 0x101   :  { %1075 = vmatmul.mubr.msk.f32.gmra.mrb[2].mxu1 %vm330_vm5, %v325_v29 }
 0x1d0   :  { %v1073_v35 = vpop.f32.mrb[0].mxu1 }
 0x1d1   :  { %v415_v36 = vadd.f32 %v1073_v35, %v927_v32  ;;  %v409_v37 = vpop.f32.mrb[1].mxu1 }
 0x1d2   :  { %v410_v38 = vadd.f32 %v927_v32, %v409_v37 }
 0x1d3   :  { %458 = vrot.lane.b32.xlu1 %v415_v36, %s1260_s19  ;;  %v933_v43 = vmul.f32 -1.442695, %v415_v36 }
 0x1d4   :  { %456 = vrot.lane.b32.xlu0 %v410_v38, %s1260_s19  ;;  %v1076_v39 = vpop.f32.mrb[2].mxu1  ;;  %v932_v44 = vmul.f32 -1.442695, %v410_v38 }
 0x1d5   :  { %v425_v40 = vadd.f32 %v1076_v39, %v927_v32  ;;  %v419_v41 = vpop.f32.mrb[3].mxu1  ;;  %1210 = vpow2.f32 %v933_v43  ;;  %v299_v39 = vld [vmem:[%s1765_s4 + $0x40] sm:$0xff] }
 0x1d6   :  { %v420_v42 = vadd.f32 %v927_v32, %v419_v41  ;;  %1212 = vpow2.f32 %v932_v44  ;;  %v300_v41 = vld [vmem:[%s1765_s4 + $0x48] sm:$0xff] }
 0x1d7   :  { %462 = vrot.lane.b32.xlu1 %v425_v40, %s1260_s19  ;;  %v935_v45 = vmul.f32 -1.442695, %v425_v40 }
 0x1d8   :  { %460 = vrot.lane.b32.xlu0 %v420_v42, %s1260_s19  ;;  %v934_v46 = vmul.f32 -1.442695, %v420_v42  ;;  %s1262_s19 = smov 96  }
 0x1d9   :  { %1214 = vpow2.f32 %v935_v45 }
 0x1da   :  { %1216 = vpow2.f32 %v934_v46 }
 0x1df   :  { %v1211_v47 = vpop.eup %1210 }
 0x1e0   :  { %v1213_v48 = vpop.eup %1212  ;;  %v441_v49 = vadd.f32 1.0, %v1211_v47 }
 0x1e1   :  { %v440_v51 = vadd.f32 1.0, %v1213_v48 }
 0x1e2   :  { %1218 = vrcp.f32 %v441_v49 }
 0x1e3   :  { %v1215_v50 = vpop.eup %1214  ;;  %1220 = vrcp.f32 %v440_v51 }
 0x1e4   :  { %v1217_v55 = vpop.eup %1216  ;;  %v443_v57 = vadd.f32 1.0, %v1215_v50  ;;  %v1263_v50 = vmov 0  }
 0x1e5   :  { %v442_v58 = vadd.f32 1.0, %v1217_v55  ;;  %1201 = vset.pattern.permute.xlu1 %v1263_v50  ;;  %1200 = vset.pattern.permute.xlu0 %v1263_v50 }
 0x1e6   :  { %1222 = vrcp.f32 %v443_v57 }
 0x1e7   :  { %1224 = vrcp.f32 %v442_v58 }
 0x1ec   :  { %v1219_v59 = vpop.eup %1218 }
 0x1ed   :  { %v1221_v62 = vpop.eup %1220  ;;  %v497_v47 = vsub.f32 1.0, %v1219_v59  ;;  %v521_v51 = vmul.f32 %v1219_v59, %v1500_v60 }
 0x1ee   :  { %v496_v49 = vsub.f32 1.0, %v1221_v62  ;;  %v520_v58 = vmul.f32 %v1221_v62, %v1504_v10 }
 0x1f0   :  { %v1223_v11 = vpop.eup %1222 }
 0x1f1   :  { %v1225_v13 = vpop.eup %1224 }
 0x245   :  { %v459_v61 = vpop.permute.xlu1 %458 }
 0x246   :  { %v469_v4 = vmul.f32 %v1219_v59, %v459_v61  ;;  %v457_v6 = vpop.permute.xlu0 %456 }
 0x247   :  { %v468_v9 = vmul.f32 %v1221_v62, %v457_v6  ;;  %v499_v6 = vsub.f32 1.0, %v1223_v11 }
 0x248   :  { %478 = vrot.lane.b32.xlu1 %v469_v4, %s1261_s12 }
 0x249   :  { %v463_v12 = vpop.permute.xlu1 %462  ;;  %476 = vrot.lane.b32.xlu0 %v468_v9, %s1261_s12 }
 0x24a   :  { %v471_v14 = vmul.f32 %v1223_v11, %v463_v12  ;;  %v461_v17 = vpop.permute.xlu0 %460 }
 0x24b   :  { %v470_v19 = vmul.f32 %v1225_v13, %v461_v17  ;;  %v523_v17 = vmul.f32 %v1223_v11, %v1510_v25  ;;  %v53_v11 = vld [vmem:[%s1762_s1 + $0x30] sm:$0xff] }
 0x24c   :  { %482 = vrot.lane.b32.xlu1 %v471_v14, %s1261_s12  ;;  %v498_v14 = vsub.f32 1.0, %v1225_v13 }
 0x24d   :  { %480 = vrot.lane.b32.xlu0 %v470_v19, %s1261_s12 }
 0x2ba   :  { %v479_v20 = vpop.permute.xlu1 %478 }
 0x2bb   :  { %v489_v21 = vadd.f32 %v479_v20, %v415_v36  ;;  %v477_v22 = vpop.permute.xlu0 %476  ;;  %v301_v36 = vld [vmem:[%s1765_s4 + $0x50] sm:$0xff] }
 0x2bc   :  { %v488_v26 = vadd.f32 %v477_v22, %v410_v38  ;;  %v1171_v38 = vpack.c.bf16 %v300_v41, %v299_v39  ;;  %v60_v39 = vld [vmem:[%s1762_s1 + $0x68] sm:$0xff]  ;;  %v51_v41 = vld [vmem:[%s1762_s1 + $0x20] sm:$0xff] }
 0x2bd   :  { %1226 = vtanh.f32 %v489_v21  ;;  %v522_v21 = vmul.f32 %v1225_v13, %v1502_v63  ;;  %v48_v13 = vld [vmem:[%s1762_s1 + $0x8] sm:$0xff] }
 0x2be   :  { %1228 = vtanh.f32 %v488_v26  ;;  %v483_v29 = vpop.permute.xlu1 %482  ;;  %1172 = vmatprep.subr.bf16.mxu1 %v1171_v38 }
 0x2bf   :  { %v491_v32 = vadd.f32 %v483_v29, %v425_v40  ;;  %v481_v35 = vpop.permute.xlu0 %480  ;;  %v302_v40 = vld [vmem:[%s1765_s4 + $0x58] sm:$0xff]  ;;  %1174 = vmatpush3.bf16.msra.mxu1 %v1171_v38  ;;  %v52_v38 = vld [vmem:[%s1762_s1 + $0x28] sm:$0xff] }
 0x2c0   :  { %v490_v37 = vadd.f32 %v481_v35, %v420_v42  ;;  %v1175_v43 = vpack.c.bf16 %v302_v40, %v301_v36  ;;  %v58_v29 = vld [vmem:[%s1762_s1 + $0x58] sm:$0xff]  ;;  %v59_v35 = vld [vmem:[%s1762_s1 + $0x60] sm:$0xff]  ;;  %v61_v36 = vld [vmem:[%s1762_s1 + $0x70] sm:$0xff] }
 0x2c1   :  { %1230 = vtanh.f32 %v491_v32  ;;  %v49_v32 = vld [vmem:[%s1762_s1 + $0x10] sm:$0xff]  ;;  %v62_v40 = vld [vmem:[%s1762_s1 + $0x78] sm:$0xff] }
 0x2c2   :  { %1232 = vtanh.f32 %v490_v37  ;;  %1176 = vmatprep.subr.bf16.mxu1 %v1175_v43  ;;  %v50_v37 = vld [vmem:[%s1762_s1 + $0x18] sm:$0xff] }
 0x2c3   :  { %1178 = vmatpush3.bf16.msra.mxu1 %v1175_v43 }
 0x2c7   :  { %v1227_v42 = vpop.eup %1226 }
 0x2c8   :  { %v1229_v44 = vpop.eup %1228  ;;  %506 = vrot.lane.b32.xlu1 %v1227_v42, %s1262_s19 }
 0x2c9   :  { %504 = vrot.lane.b32.xlu0 %v1229_v44, %s1262_s19 }
 0x2cb   :  { %v1231_v45 = vpop.eup %1230 }
 0x2cc   :  { %v1233_v46 = vpop.eup %1232  ;;  %510 = vrot.lane.b32.xlu1 %v1231_v45, %s1262_s19 }
 0x2cd   :  { %508 = vrot.lane.b32.xlu0 %v1233_v46, %s1262_s19  ;;  %v1612_v46 = vand.u32 127, %v63_v3 }
 0x33a   :  { %v507_v48 = vpop.permute.xlu1 %506 }
 0x33b   :  { %v517_v55 = vmul.f32 %v507_v48, %v497_v47  ;;  %v505_v57 = vpop.permute.xlu0 %504 }
 0x33c   :  { %v516_v61 = vmul.f32 %v505_v57, %v496_v49 }
 0x33d   :  { %v525_v4 = vadd.f32 %v521_v51, %v517_v55 }
 0x33e   :  { %v524_v9 = vadd.f32 %v520_v58, %v516_v61  ;;  %v511_v12 = vpop.permute.xlu1 %510 }
 0x33f   :  { %v519_v19 = vmul.f32 %v511_v12, %v499_v6  ;;  %v509_v20 = vpop.permute.xlu0 %508  ;;  %v537_v59 = vsel %vm288_vm6, %v525_v4, %v1500_v60  ;;  %v936_v4 = vld [vmem:[%s1766_s5 + $0x1] ss:$0 sm:$0xff]  ;;  %s1264_s5 = smov [#allocation2]  }
 0x340   :  { %v518_v22 = vmul.f32 %v509_v20, %v498_v14  ;;  %546 = vrot.lane.b32.xlu1 %v537_v59, %s1262_s19  ;;  %v536_v62 = vsel %vm287_vm7, %v524_v9, %v1504_v10  ;;  %v54_v10 = vld [vmem:[%s1762_s1 + $0x38] sm:$0xff]  ;;  %s889_s25 = sshll.u32 %s1264_s5, 4  ;;  %s890_s25 = int_to_ptr.vmem [resolvable:$true] %s889_s25 }
 0x341   :  { %v527_v26 = vadd.f32 %v523_v17, %v519_v19  ;;  %544 = vrot.lane.b32.xlu0 %v536_v62, %s1262_s19  ;;  %s1234_s26 = scalar_lea.vmem %s890_s25, 512  ;;  %p1239_p1 = scmp.lt.s32.totalorder %s890_s25, %s890_s25 }
 0x342   :  { %v526_v54 = vadd.f32 %v522_v21, %v518_v22  ;;  %p1235_p0 = scmp.ne.s32.totalorder %s890_s25, %s1234_s26  ;;  %p1240_p2 = scmp.lt.s32.totalorder %s1234_s26, %s1234_s26 }
 0x343   :  { %v539_v52 = vsel %vm290_vm8, %v527_v26, %v1510_v25  ;;  %v57_v25 = vld [vmem:[%s1762_s1 + $0x50] sm:$0xff] }
 0x344   :  { %550 = vrot.lane.b32.xlu1 %v539_v52, %s1262_s19  ;;  %v538_v60 = vsel %vm289_vm9, %v526_v54, %v1502_v63  ;;  %v47_v63 = vld [vmem:[%s1762_s1] sm:$0xff]  ;;  %p1241_p3 = por %p1240_p2, %p1239_p1 }
 0x345   :  { %548 = vrot.lane.b32.xlu0 %v538_v60, %s1262_s19 }
 0x346   :  { %p1242_p4 = pnand %p1241_p3, %p1235_p0 }
 0x348   :  { %108 = vperm.xlu1 %1201, %v54_v10  }
 0x349   :  { %105 = vperm.xlu0 %1200, %v53_v11  }
 0x34c   :  { %111 = vperm.xlu1 %1201, %v55_v53  }
 0x34d   :  { %114 = vperm.xlu0 %1200, %v56_v56  }
 0x350   :  { %87 = vperm.xlu1 %1201, %v47_v63  }
 0x351   :  { %117 = vperm.xlu0 %1200, %v57_v25  }
 0x354   :  { %90 = vperm.xlu1 %1201, %v48_v13  }
 0x355   :  { %120 = vperm.xlu0 %1200, %v58_v29  }
 0x358   :  { %93 = vperm.xlu1 %1201, %v49_v32  }
 0x359   :  { %123 = vperm.xlu0 %1200, %v59_v35  }
 0x35c   :  { %96 = vperm.xlu1 %1201, %v50_v37  }
 0x35d   :  { %126 = vperm.xlu0 %1200, %v60_v39  }
 0x360   :  { %99 = vperm.xlu1 %1201, %v51_v41  }
 0x361   :  { %129 = vperm.xlu0 %1200, %v61_v36  }
 0x364   :  { %102 = vperm.xlu1 %1201, %v52_v38  }
 0x365   :  { %132 = vperm.xlu0 %1200, %v62_v40  }
 0x3b2   :  { %v547_v42 = vpop.permute.xlu1 %546 }
 0x3b3   :  { %557 = vst.msk [vmem:[#allocation2 + $0x8] sm:$0xff] %vm321_vm4, %v547_v42  ;;  %v545_v43 = vpop.permute.xlu0 %544 }
 0x3b4   :  { %556 = vst.msk [vmem:[#allocation2] sm:$0xff] %vm321_vm4, %v545_v43  ;;  %1085 = vmatprep.mubr.msk.f32.mxu1 %vm321_vm4, %v545_v43 }
 0x3b5   :  { %1086 = vmatmul.mubr.msk.f32.vlgmr.msra.gmra.mrb[4].mxu1 %vm321_vm4, %v547_v42 }
 0x3b6   :  { %v551_v44 = vpop.permute.xlu1 %550 }
 0x3b7   :  { %559 = vst.msk [vmem:[#allocation2 + $0x18] sm:$0xff] %vm321_vm4, %v551_v44  ;;  %v549_v45 = vpop.permute.xlu0 %548 }
 0x3b8   :  { %558 = vst.msk [vmem:[#allocation2 + $0x10] sm:$0xff] %vm321_vm4, %v549_v45  ;;  %1088 = vmatprep.mubr.msk.f32.mxu1 %vm321_vm4, %v549_v45 }
 0x3b9   :  { %1089 = vmatmul.mubr.msk.f32.gmra.mrb[6].mxu1 %vm321_vm4, %v551_v44 }
 0x3c7   :  { %v109_v47 = vpop.permute.xlu1 %108 }
 0x3c8   :  { %vm141_vm10 = vcmp.eq.s32.totalorder %v1612_v46, %v109_v47  ;;  %v106_v48 = vpop.permute.xlu0 %105 }
 0x3c9   :  { %vm140_vm11 = vcmp.eq.s32.totalorder %v1612_v46, %v106_v48  ;;  %v914_v10 = vsel %vm141_vm10, 1.0, %v1259_v18 }
 0x3ca   :  { %v913_v49 = vsel %vm140_vm11, 1.0, %v1259_v18 }
 0x3cb   :  { %v112_v50 = vpop.permute.xlu1 %111  ;;  %1108 = vmatprep.mubr.msk.f32.mxu1 %vm321_vm4, %v913_v49 }
 0x3cc   :  { %vm142_vm12 = vcmp.eq.s32.totalorder %v1612_v46, %v112_v50  ;;  %v115_v3 = vpop.permute.xlu0 %114 }
 0x3cd   :  { %v915_v53 = vsel %vm142_vm12, 1.0, %v1259_v18  ;;  %vm143_vm0 = vcmp.eq.s32.totalorder %v1612_v46, %v115_v3 }
 0x3ce   :  { %v916_v25 = vsel %vm143_vm0, 1.0, %v1259_v18 }
 0x3cf   :  { %v88_v51 = vpop.permute.xlu1 %87 }
 0x3d0   :  { %vm134_vm13 = vcmp.eq.s32.totalorder %v1612_v46, %v88_v51  ;;  %v118_v58 = vpop.permute.xlu0 %117 }
 0x3d1   :  { %v907_v55 = vsel %vm134_vm13, 1.0, %v1259_v18  ;;  %vm144_vm2 = vcmp.eq.s32.totalorder %v1612_v46, %v118_v58 }
 0x3d2   :  { %1099 = vmatprep.mubr.msk.f32.mxu0 %vm321_vm4, %v907_v55  ;;  %v917_v32 = vsel %vm144_vm2, 1.0, %v1259_v18 }
 0x3d3   :  { %v91_v57 = vpop.permute.xlu1 %90 }
 0x3d4   :  { %v121_v6 = vpop.permute.xlu0 %120  ;;  %vm135_vm14 = vcmp.eq.s32.totalorder %v1612_v46, %v91_v57 }
 0x3d5   :  { %v908_v11 = vsel %vm135_vm14, 1.0, %v1259_v18  ;;  %vm145_vm5 = vcmp.eq.s32.totalorder %v1612_v46, %v121_v6 }
 0x3d6   :  { %v918_v37 = vsel %vm145_vm5, 1.0, %v1259_v18 }
 0x3d7   :  { %v94_v61 = vpop.permute.xlu1 %93 }
 0x3d8   :  { %v124_v21 = vpop.permute.xlu0 %123  ;;  %vm136_vm15 = vcmp.eq.s32.totalorder %v1612_v46, %v94_v61 }
 0x3d9   :  { %v909_v56 = vsel %vm136_vm15, 1.0, %v1259_v18  ;;  %vm146_vm7 = vcmp.eq.s32.totalorder %v1612_v46, %v124_v21 }
 0x3da   :  { %v919_v41 = vsel %vm146_vm7, 1.0, %v1259_v18 }
 0x3db   :  { %v97_v19 = vpop.permute.xlu1 %96 }
 0x3dc   :  { %v127_v60 = vpop.permute.xlu0 %126  ;;  %vm137_vm1 = vcmp.eq.s32.totalorder %v1612_v46, %v97_v19 }
 0x3dd   :  { %v910_v13 = vsel %vm137_vm1, 1.0, %v1259_v18  ;;  %vm147_vm8 = vcmp.eq.s32.totalorder %v1612_v46, %v127_v60 }
 0x3de   :  { %v920_v38 = vsel %vm147_vm8, 1.0, %v1259_v18 }
 0x3df   :  { %v100_v52 = vpop.permute.xlu1 %99 }
 0x3e0   :  { %vm138_vm3 = vcmp.eq.s32.totalorder %v1612_v46, %v100_v52  ;;  %v130_v29 = vpop.permute.xlu0 %129 }
 0x3e1   :  { %v911_v35 = vsel %vm138_vm3, 1.0, %v1259_v18  ;;  %vm148_vm9 = vcmp.eq.s32.totalorder %v1612_v46, %v130_v29 }
 0x3e2   :  { %v921_v40 = vsel %vm148_vm9, 1.0, %v1259_v18 }
 0x3e3   :  { %v103_v63 = vpop.permute.xlu1 %102 }
 0x3e4   :  { %vm139_vm6 = vcmp.eq.s32.totalorder %v1612_v46, %v103_v63  ;;  %v133_v36 = vpop.permute.xlu0 %132 }
 0x3e5   :  { %v912_v39 = vsel %vm139_vm6, 1.0, %v1259_v18  ;;  %vm149_vm10 = vcmp.eq.s32.totalorder %v1612_v46, %v133_v36 }
 0x3e6   :  { %v922_v42 = vsel %vm149_vm10, 1.0, %v1259_v18 }
 0x488   :  { %v1087_v9 = vpop.f32.mrb[4].mxu1 }
 0x489   :  { %v644_v12 = vadd.f32 %v1087_v9, %v936_v4  ;;  %v638_v14 = vpop.f32.mrb[5].mxu1 }
 0x48a   :  { %v639_v17 = vadd.f32 %v936_v4, %v638_v14 }
 0x48c   :  { %v1179_v20 = vpack.c.bf16 %v644_v12, %v639_v17  ;;  %v1090_v59 = vpop.f32.mrb[6].mxu1 }
 0x48d   :  { %v654_v22 = vadd.f32 %v1090_v59, %v936_v4  ;;  %v648_v62 = vpop.f32.mrb[7].mxu1 }
 0x48e   :  { %v649_v26 = vadd.f32 %v936_v4, %v648_v62  ;;  %1180 = vmatprep.subr.bf16.mxu0 %v1179_v20  ;;  %1187 = vmatprep.subr.bf16.mxu1 %v1179_v20 }
 0x48f   :  { %1182 = vmatpush3.bf16.msra.mxu0 %v1179_v20  ;;  %1189 = vmatpush3.bf16.msra.mxu1 %v1179_v20 }
 0x490   :  { %v1183_v54 = vpack.c.bf16 %v654_v22, %v649_v26 }
 0x492   :  { %1184 = vmatprep.subr.bf16.mxu0 %v1183_v54  ;;  %1188 = vmatprep.subr.bf16.mxu1 %v1183_v54 }
 0x493   :  { %1186 = vmatpush3.bf16.msra.mxu0 %v1183_v54  ;;  %1190 = vmatpush3.bf16.msra.mxu1 %v1183_v54 }
 0x496   :  { %1100 = vmatmul.mubr.msk.f32.vlgmr.msra.gmra.mrb[4].mxu0 %vm321_vm4, %v908_v11  ;;  %1109 = vmatmul.mubr.msk.f32.vlgmr.msra.gmra.mrb[8].mxu1 %vm321_vm4, %v914_v10 }
 0x497   :  { %1102 = vmatprep.mubr.msk.f32.mxu0 %vm321_vm4, %v909_v56  ;;  %1111 = vmatprep.mubr.msk.f32.mxu1 %vm321_vm4, %v915_v53 }
 0x49a   :  { %1103 = vmatmul.mubr.msk.f32.gmra.mrb[6].mxu0 %vm321_vm4, %v910_v13  ;;  %1112 = vmatmul.mubr.msk.f32.gmra.mrb[10].mxu1 %vm321_vm4, %v916_v25 }
 0x49b   :  { %1105 = vmatprep.mubr.msk.f32.mxu0 %vm321_vm4, %v911_v35  ;;  %1114 = vmatprep.mubr.msk.f32.mxu1 %vm321_vm4, %v917_v32 }
 0x49e   :  { %1106 = vmatmul.mubr.msk.f32.gmra.mrb[8].mxu0 %vm321_vm4, %v912_v39  ;;  %1115 = vmatmul.mubr.msk.f32.gmra.mrb[12].mxu1 %vm321_vm4, %v918_v37 }
 0x49f   :  { %1117 = vmatprep.mubr.msk.f32.mxu1 %vm321_vm4, %v919_v41 }
 0x4a2   :  { %1118 = vmatmul.mubr.msk.f32.gmra.mrb[14].mxu1 %vm321_vm4, %v920_v38 }
 0x4a3   :  { %1120 = vmatprep.mubr.msk.f32.mxu1 %vm321_vm4, %v921_v40 }
 0x4a6   :  { %1121 = vmatmul.mubr.msk.f32.gmra.mrb[16].mxu1 %vm321_vm4, %v922_v42 }
 0x4a7   :  { %1245 = shalt.err (!%p1242_p4)
}
 0x4a8   :  { %s1246_s29 = scalar_lea.hbm %s1768_s7, 512 }
 0x4a9   :  { %p1247_p5 = scmp.ne.s32.totalorder %s1768_s7, %s1246_s29  ;;  %p1250_p6 = scmp.lt.u32.totalorder %s1246_s29, %s1768_s7 }
 0x4ab   :  { %p1252_p7 = pnand %p1250_p6, %p1247_p5 }
 0x4ad   :  { %1255 = shalt.err (!%p1252_p7)
}
 0x4ae   :  { %s1265_s10 = smov 128   ;;  %s1266_s11 = smov 8  }
 0x4af   :  { %895 = dma.vmem_to_hbm [thread:$0]  %s890_s25, 512, %s1768_s7, [#allocation3], %s1265_s10, %s1265_s10, %s1266_s11  }
 0x569   :  { %v1101_v18 = vpop.f32.mrb[4].mxu0  ;;  %v1110_v43 = vpop.f32.mrb[8].mxu1 }
 0x56a   :  { %v851_v44 = vadd.f32 %v1101_v18, %v1315_v1  ;;  %v857_v45 = vadd.f32 %v1110_v43, %v1363_v16  ;;  %v771_v46 = vpop.f32.mrb[5].mxu0  ;;  %v801_v47 = vpop.f32.mrb[9].mxu1 }
 0x56b   :  { %v850_v48 = vadd.f32 %v771_v46, %v1310_v0  ;;  %v856_v49 = vadd.f32 %v801_v47, %v1358_v15 }
 0x56c   :  { %867 = vst.msk [vmem:[%s1767_s6 + $0x8] sm:$0xff] %vm321_vm4, %v851_v44  ;;  %873 = vst.msk [vmem:[%s1767_s6 + $0x38] sm:$0xff] %vm321_vm4, %v857_v45 }
 0x56d   :  { %866 = vst.msk [vmem:[%s1767_s6] sm:$0xff] %vm321_vm4, %v850_v48  ;;  %872 = vst.msk [vmem:[%s1767_s6 + $0x30] sm:$0xff] %vm321_vm4, %v856_v49  ;;  %v1104_v0 = vpop.f32.mrb[6].mxu0  ;;  %v1113_v1 = vpop.f32.mrb[10].mxu1 }
 0x56e   :  { %v853_v15 = vadd.f32 %v1104_v0, %v1327_v5  ;;  %v859_v16 = vadd.f32 %v1113_v1, %v1392_v24  ;;  %v781_v50 = vpop.f32.mrb[7].mxu0  ;;  %v811_v51 = vpop.f32.mrb[11].mxu1 }
 0x56f   :  { %v852_v55 = vadd.f32 %v781_v50, %v1320_v2  ;;  %v858_v3 = vadd.f32 %v811_v51, %v1387_v23 }
 0x570   :  { %869 = vst.msk [vmem:[%s1767_s6 + $0x18] sm:$0xff] %vm321_vm4, %v853_v15  ;;  %875 = vst.msk [vmem:[%s1767_s6 + $0x48] sm:$0xff] %vm321_vm4, %v859_v16 }
 0x571   :  { %868 = vst.msk [vmem:[%s1767_s6 + $0x10] sm:$0xff] %vm321_vm4, %v852_v55  ;;  %874 = vst.msk [vmem:[%s1767_s6 + $0x40] sm:$0xff] %vm321_vm4, %v858_v3  ;;  %v1107_v2 = vpop.f32.mrb[8].mxu0  ;;  %v1116_v5 = vpop.f32.mrb[12].mxu1 }
 0x572   :  { %v855_v23 = vadd.f32 %v1107_v2, %v1339_v8  ;;  %v861_v24 = vadd.f32 %v1116_v5, %v1408_v28  ;;  %v791_v57 = vpop.f32.mrb[9].mxu0  ;;  %v821_v58 = vpop.f32.mrb[13].mxu1 }
 0x573   :  { %v854_v61 = vadd.f32 %v791_v57, %v1334_v7  ;;  %v860_v4 = vadd.f32 %v821_v58, %v1403_v27 }
 0x574   :  { %871 = vst.msk [vmem:[%s1767_s6 + $0x28] sm:$0xff] %vm321_vm4, %v855_v23  ;;  %877 = vst.msk [vmem:[%s1767_s6 + $0x58] sm:$0xff] %vm321_vm4, %v861_v24 }
 0x575   :  { %870 = vst.msk [vmem:[%s1767_s6 + $0x20] sm:$0xff] %vm321_vm4, %v854_v61  ;;  %876 = vst.msk [vmem:[%s1767_s6 + $0x50] sm:$0xff] %vm321_vm4, %v860_v4  ;;  %v1119_v7 = vpop.f32.mrb[14].mxu1 }
 0x576   :  { %v863_v8 = vadd.f32 %v1119_v7, %v1420_v31  ;;  %v831_v27 = vpop.f32.mrb[15].mxu1 }
 0x577   :  { %v862_v28 = vadd.f32 %v831_v27, %v1415_v30 }
 0x578   :  { %879 = vst.msk [vmem:[%s1767_s6 + $0x68] sm:$0xff] %vm321_vm4, %v863_v8 }
 0x579   :  { %878 = vst.msk [vmem:[%s1767_s6 + $0x60] sm:$0xff] %vm321_vm4, %v862_v28  ;;  %v1122_v6 = vpop.f32.mrb[16].mxu1 }
 0x57a   :  { %v865_v9 = vadd.f32 %v1122_v6, %v1432_v34  ;;  %v841_v12 = vpop.f32.mrb[17].mxu1 }
 0x57b   :  { %v864_v14 = vadd.f32 %v841_v12, %v1427_v33 }
 0x57c   :  { %881 = vst.msk [vmem:[%s1767_s6 + $0x78] sm:$0xff] %vm321_vm4, %v865_v9 }
 0x57d   :  { %880 = vst.msk [vmem:[%s1767_s6 + $0x70] sm:$0xff] %vm321_vm4, %v864_v14 }
 0x57e   :  { %1256 = dma.done.wait [#allocation3], 512  }
 0x57f   :  { %1257 = vsyncadd [#allocation3], 4294966784 }
 0x580   :  { %901 = vsyncpa [#allocation3], 1 }

</bundles_post_ra>
